<compile_context>
chip_gen: v5e
topology: v5e:2x2
jax: 0.10.0
libtpu: 0.0.40
codegen_flags: <defaults>
</compile_context>

<pallas_src>
import jax
import jax.numpy as jnp
from jax.experimental import pallas as pl
from jax.experimental.pallas import tpu as pltpu


_ONEHOT_BUDGET_BYTES = 4 << 20    # cap on the (V, TN) one-hot temporary
_VMEM_TARGET_BYTES = 24 << 20     # conservative working-set target across v5e/v6e/v7x
_VMEM_LIMIT_CAP = 64 << 20        # v7x physical VMEM per TensorCore


def _round_up(x, m):
    return ((x + m - 1) // m) * m


def _embedding_onehot_kernel(idx_ref, table_ref, out_ref):
    # idx_ref:   (1, 1, TN) int32 -- lane-dense token indices for this tile.
    # table_ref: (V, D)           -- whole table, single VMEM-resident copy.
    # out_ref:   (TN, D)          -- this tile's embeddings (pipelined to HBM).
    v = table_ref.shape[0]
    tn = out_ref.shape[0]

    idx = idx_ref[0]                                   # (1, TN), lane-major
    idx = jnp.clip(idx, 0, v - 1)                      # VMEM reads are unchecked

    # Transposed one-hot (V, TN): vocab iota runs along sublanes, tokens stay on
    # lanes, so the lane-major index vector broadcasts without any relayout.
    iota = jax.lax.broadcasted_iota(jnp.int32, (v, tn), 0)
    onehot = (iota == idx).astype(table_ref.dtype)     # (V, TN)

    # Gather as an MXU matmul with the shared V axis contracted on dim 0 of both
    # operands (trans_a): (V, TN)^T @ (V, D) -> (TN, D). Exact for a gather.
    out = jax.lax.dot_general(
        onehot, table_ref[...],
        dimension_numbers=(((0,), (0,)), ((), ())),
        preferred_element_type=jnp.float32)
    out_ref[...] = out.astype(out_ref.dtype)


def _pick_token_tile(n_tokens, vocab, dim, dtype_bytes, tn_max):
    """Largest lane-aligned token tile that fits the VMEM / one-hot budgets."""
    table_bytes = vocab * dim * dtype_bytes

    def fits(t):
        onehot = t * vocab * 4
        out_bufs = 2 * t * dim * dtype_bytes          # double-buffered output tiles
        idx_bufs = 2 * 8 * t * 4                      # sublane-padded index blocks
        return (onehot <= _ONEHOT_BUDGET_BYTES
                and table_bytes + out_bufs + idx_bufs + onehot <= _VMEM_TARGET_BYTES)

    tn = max(128, (tn_max // 128) * 128)
    while tn > 128 and not fits(tn):
        tn //= 2
    # Small inputs: one shrunken tile instead of a mostly-padded 128+ tile.
    if n_tokens <= tn:
        tn = max(8, _round_up(n_tokens, 8))
    return tn


def word_embedding_forward(input_sentence, embedding_weight, *, tn_max=1024):
    """Pallas equivalent of word_embedding.forward (embedding lookup).

    input_sentence:   integer array of word indices, any shape.
    embedding_weight: (V, D) float array (small vocab: table must fit VMEM).
    returns:          array of shape input_sentence.shape + (D,).
    """
    idx_shape = input_sentence.shape
    flat_idx = input_sentence.reshape(-1).astype(jnp.int32)
    n_tokens = flat_idx.shape[0]
    vocab, dim = embedding_weight.shape
    dtype_bytes = embedding_weight.dtype.itemsize
    table_bytes = vocab * dim * dtype_bytes

    if table_bytes > _VMEM_TARGET_BYTES // 2:
        # TODO(synk): large-vocab path -- keep the table in HBM (memory_space=pl.ANY)
        # and DMA-gather rows with scalar-prefetched indices instead of the one-hot
        # matmul (one-hot cost scales O(TN*V)); fall back to a plain XLA gather here.
        return embedding_weight[input_sentence]

    tn = _pick_token_tile(n_tokens, vocab, dim, dtype_bytes, tn_max)
    n_tiles = pl.cdiv(n_tokens, tn)
    n_pad = n_tiles * tn

    # Lane-dense per-tile index blocks: (n_tiles, 1, TN) int32.
    idx_padded = (
        jnp.zeros((n_pad,), dtype=jnp.int32)
        .at[:n_tokens].set(flat_idx)
        .reshape(n_tiles, 1, tn)
    )

    # Explicit scoped-VMEM limit: table + 2x output tiles + one-hot temp + index
    # buffers, with 2x headroom, capped at v7x's 64 MiB physical VMEM.
    needed = (table_bytes
              + 2 * tn * dim * dtype_bytes
              + tn * vocab * 4
              + 2 * 8 * tn * 4)
    vmem_limit = int(min(2 * needed + (2 << 20), _VMEM_LIMIT_CAP))

    out_padded = pl.pallas_call(
        _embedding_onehot_kernel,
        out_shape=jax.ShapeDtypeStruct((n_pad, dim), embedding_weight.dtype),
        grid=(n_tiles,),
        in_specs=[
            # Per-tile indices: lane-major (1, 1, TN) block -> one contiguous DMA.
            pl.BlockSpec((1, 1, tn), lambda i: (i, 0, 0)),
            # Whole table resident in VMEM once (no per-step DMA, no double buffer).
            pl.BlockSpec(memory_space=pltpu.MemorySpace.VMEM),
        ],
        out_specs=pl.BlockSpec((tn, dim), lambda i: (i, 0)),
        compiler_params=pltpu.CompilerParams(
            dimension_semantics=("parallel",),   # token tiles split across TCs (v7x)
            vmem_limit_bytes=vmem_limit,
        ),
    )(idx_padded, embedding_weight)

    return out_padded[:n_tokens].reshape(idx_shape + (dim,))


if __name__ == "__main__":
    # Module hyper-params (deterministic, in-script init; no checkpoint load).
    vocab_length = 64
    embedding_dim = 128   # lane-aligned embedding width

    key = jax.random.PRNGKey(0)
    k_w, k_idx = jax.random.split(key)

    # nn.Embedding weight initialized uniform(-1, 1), as in the PyTorch module.
    embedding_weight = jax.random.uniform(
        k_w, (vocab_length, embedding_dim),
        minval=-1.0, maxval=1.0, dtype=jnp.float32)

    # Example input: batch=2, seq=8 word indices.
    batch, seq = 2, 8
    input_sentence = jax.random.randint(
        k_idx, (batch, seq), minval=0, maxval=vocab_length, dtype=jnp.int32)

    out = word_embedding_forward(input_sentence, embedding_weight)
    out = jax.block_until_ready(out)

    # Reference check (plain JAX gather).
    ref = embedding_weight[input_sentence]
    assert out.shape == (batch, seq, embedding_dim)
    assert jnp.allclose(out, ref), "Pallas embedding lookup mismatch"

    print("KERNEL_OK")
</pallas_src>

<mosaic_0001>
module attributes {stable_mosaic.version = 11 : i64} {
  func.func @_embedding_onehot_kernel(%arg0: i32, %arg1: memref<1x1x16xi32, #tpu.memory_space<vmem>>, %arg2: memref<64x128xf32, #tpu.memory_space<vmem>>, %arg3: memref<16x128xf32, #tpu.memory_space<vmem>>) attributes {dimension_semantics = [#tpu.dimension_semantics<parallel>], iteration_bounds = array<i64: 1>, scalar_prefetch = 0 : i64, scratch_operands = 0 : i64, tpu.core_type = #tpu.core_type<tc>, window_params = [{transform_indices = @transform_0, window_bounds = array<i64: 1, 1, 16>}, {pipeline_mode = #tpu.pipeline_mode<synchronous>, transform_indices = @transform_1, window_bounds = array<i64: 64, 128>}, {transform_indices = @transform_2, window_bounds = array<i64: 16, 128>}]} {
    %c0 = arith.constant 0 : index
    %c0_0 = arith.constant 0 : index
    %c0_1 = arith.constant 0 : index
    %0 = vector.load %arg1[%c0, %c0_0, %c0_1] : memref<1x1x16xi32, #tpu.memory_space<vmem>>, vector<1x1x16xi32>
    %1 = vector.shape_cast %0 : vector<1x1x16xi32> to vector<1x16xi32>
    %c0_i32 = arith.constant 0 : i32
    %c63_i32 = arith.constant 63 : i32
    %2 = vector.broadcast %c0_i32 : i32 to vector<1x16xi32>
    %3 = arith.maxsi %2, %1 : vector<1x16xi32>
    %4 = vector.broadcast %c63_i32 : i32 to vector<1x16xi32>
    %5 = arith.minsi %4, %3 : vector<1x16xi32>
    %6 = tpu.iota {dimensions = array<i32: 0>} : vector<64x16xi32>
    %7 = vector.broadcast %5 : vector<1x16xi32> to vector<64x16xi32>
    %8 = arith.cmpi eq, %6, %7 : vector<64x16xi32>
    %9 = arith.extui %8 : vector<64x16xi1> to vector<64x16xi32>
    %10 = arith.sitofp %9 : vector<64x16xi32> to vector<64x16xf32>
    %c0_2 = arith.constant 0 : index
    %c0_3 = arith.constant 0 : index
    %11 = vector.load %arg2[%c0_2, %c0_3] : memref<64x128xf32, #tpu.memory_space<vmem>>, vector<64x128xf32>
    %cst = arith.constant dense<0.000000e+00> : vector<16x128xf32>
    %12 = tpu.matmul %10, %11, %cst {dimension_numbers = #tpu.dot_dimension_numbers<[0], [0], [1], [1], [0, 1, 1, 1], [], []>} : vector<64x16xf32>, vector<64x128xf32>, vector<16x128xf32> -> vector<16x128xf32>
    %c0_4 = arith.constant 0 : index
    %c0_5 = arith.constant 0 : index
    %13 = vector.load %arg3[%c0_4, %c0_5] : memref<16x128xf32, #tpu.memory_space<vmem>>, vector<16x128xf32>
    tpu.vector_store %arg3[%c0_4, %c0_5], %12 {strides = array<i32>} : memref<16x128xf32, #tpu.memory_space<vmem>>, vector<16x128xf32>,
    return
  }
  func.func @transform_0(%arg0: i32) -> (i32, i32, i32) {
    %c0_i32 = arith.constant 0 : i32
    %c0_i32_0 = arith.constant 0 : i32
    %c0_i32_1 = arith.constant 0 : i32
    return %arg0, %c0_i32, %c0_i32_0 : i32, i32, i32
  }
  func.func @transform_1(%arg0: i32) -> (i32, i32) {
    %c0_i32 = arith.constant 0 : i32
    %c0_i32_0 = arith.constant 0 : i32
    %c0_i32_1 = arith.constant 0 : i32
    return %c0_i32, %c0_i32_0 : i32, i32
  }
  func.func @transform_2(%arg0: i32) -> (i32, i32) {
    %c0_i32 = arith.constant 0 : i32
    %c0_i32_0 = arith.constant 0 : i32
    return %arg0, %c0_i32 : i32, i32
  }
}

</mosaic_0001>

<bundles_post_ra>
// kernel: tpu_custom_call.1
= control target key start
LH: loop header
LB: loop body
LE: loop exit
PB: predicated region body
PF: predicated region fallthrough
CT: control target
= control target key end

     0   :  { %7 = vsyncpa [#allocation3], 0  ;;  %s311_s0 = inlined_call_operand.hbm [shape: s32[1,1,16], index: 0, kind: input, shape index: {}]   ;;  %s312_s1 = inlined_call_operand.hbm [shape: f32[64,128], index: 1, kind: input, shape index: {}]   ;;  %s313_s2 = inlined_call_operand.hbm [shape: f32[16,128], index: 2, kind: output, shape index: {}]  }
   0x1   :  { %8 = vsyncpa [#allocation6], 0 }
   0x2   :  { %9 = vsyncpa [#allocation4], 0  ;;  %s15_s11 = sshll.u32 %s311_s0, 4  ;;  %s275_s12 = smov [#allocation2]   ;;  %s16_s11 = int_to_ptr.hbm [resolvable:$true] %s15_s11 }
   0x3   :  { %s17_s13 = sshll.u32 %s275_s12, 4  ;;  %s25_s16 = sshll.u32 %s312_s1, 4  ;;  %s18_s13 = int_to_ptr.vmem [resolvable:$true] %s17_s13  ;;  %s26_s16 = int_to_ptr.hbm [resolvable:$true] %s25_s16 }
   0x4   :  { %20 = dma.hbm_to_vmem [thread:$0]  %s16_s11, 16, %s18_s13, [#allocation3]  }
   0x5   :  { %s276_s17 = smov [#allocation5]   ;;  %s277_s19 = smov 128  }
   0x6   :  { %s27_s18 = sshll.u32 %s276_s17, 4  ;;  %s278_s20 = smov 8   ;;  %s28_s18 = int_to_ptr.vmem [resolvable:$true] %s27_s18 }
   0x7   :  { %33 = dma.hbm_to_vmem [thread:$0]  %s26_s16, 1024, %s28_s18, [#allocation6], %s277_s19, %s277_s19, %s278_s20  }
   0x8   :  { %269 = dma.done.wait [#allocation3], 16  }
   0x9   :  { %270 = vsyncadd [#allocation3], 4294967280 }
   0xa   :  { %271 = dma.done.wait [#allocation6], 1024  }
   0xb   :  { %272 = vsyncadd [#allocation6], 4294966272  ;;  %v47_v0 = vlaneseq  ;;  %v42_v1 = vld [vmem:[#allocation2] sm:$0x1]  ;;  %v279_v7 = vmov 0.0   ;;  %v87_v16 = vld [vmem:[#allocation5 + $0x30] sm:$0xff] }
   0xc   :  { %vm43_vm0 = vcmp.gt.s32.totalorder %v42_v1, 0  ;;  %v88_v15 = vld [vmem:[#allocation5 + $0x38] sm:$0xff]  ;;  %v86_v17 = vld [vmem:[#allocation5 + $0x28] sm:$0xff]  ;;  %v85_v18 = vld [vmem:[#allocation5 + $0x20] sm:$0xff]  ;;  %vm121_vm10 = vcmask 523264   ;;  %s280_s0 = smov [#allocation7]  }
   0xd   :  { %v44_v2 = vsel %vm43_vm0, %v42_v1, 0  ;;  %v48_v3 = vshrl.u32 %v47_v0, 7  ;;  %136 = vmatpush.msra.mxu0 %v88_v15  ;;  %183 = vmatpush.msra.mxu1 %v88_v15  ;;  %v84_v21 = vld [vmem:[#allocation5 + $0x18] sm:$0xff]  ;;  %v83_v22 = vld [vmem:[#allocation5 + $0x10] sm:$0xff]  ;;  %v82_v23 = vld [vmem:[#allocation5 + $0x8] sm:$0xff]  ;;  %s157_s1 = sshll.u32 %s280_s0, 4  ;;  %s158_s1 = int_to_ptr.vmem [resolvable:$true] %s157_s1 }
   0xe   :  { %vm45_vm1 = vcmp.lt.s32.totalorder %v44_v2, 63  ;;  %v81_v24 = vld [vmem:[#allocation5] sm:$0xff]  ;;  %s159_s23 = sshll.u32 %s313_s2, 4  ;;  %s160_s23 = int_to_ptr.hbm [resolvable:$true] %s159_s23 }
   0xf   :  { %v46_v4 = vsel %vm45_vm1, %v44_v2, 63  ;;  %v49_v6 = vadd.s32 8, %v48_v3  ;;  %v50_v10 = vadd.s32 16, %v48_v3  ;;  %v51_v12 = vadd.s32 24, %v48_v3  ;;  %137 = vmatpush.msra.mxu0 %v87_v16  ;;  %184 = vmatpush.msra.mxu1 %v87_v16 }
  0x10   :  { %v56_v5 = vperm.slane %v46_v4, 0  ;;  %v52_v14 = vadd.s32 32, %v48_v3  ;;  %v53_v20 = vadd.s32 40, %v48_v3  ;;  %v54_v26 = vadd.s32 48, %v48_v3 }
  0x11   :  { %138 = vmatpush.msra.mxu0 %v86_v17  ;;  %185 = vmatpush.msra.mxu1 %v86_v17  ;;  %v55_v28 = vadd.s32 56, %v48_v3 }
  0x12   :  { %vm57_vm2 = vcmp.eq.s32.totalorder %v48_v3, %v56_v5  ;;  %vm58_vm3 = vcmp.eq.s32.totalorder %v49_v6, %v56_v5  ;;  %vm59_vm4 = vcmp.eq.s32.totalorder %v50_v10, %v56_v5  ;;  %vm60_vm5 = vcmp.eq.s32.totalorder %v51_v12, %v56_v5 }
  0x13   :  { %v173_v8 = vsel %vm57_vm2, 1.0, %v279_v7  ;;  %v174_v9 = vsel %vm58_vm3, 1.0, %v279_v7  ;;  %v175_v11 = vsel %vm59_vm4, 1.0, %v279_v7  ;;  %v176_v13 = vsel %vm60_vm5, 1.0, %v279_v7  ;;  %139 = vmatpush.msra.mxu0 %v85_v18  ;;  %186 = vmatpush.msra.mxu1 %v85_v18 }
  0x14   :  { %89 = vxpose.xlu0.b32.start [1/8] (short) (narrow) %v173_v8, 16  ;;  %vm61_vm6 = vcmp.eq.s32.totalorder %v52_v14, %v56_v5  ;;  %vm62_vm7 = vcmp.eq.s32.totalorder %v53_v20, %v56_v5  ;;  %vm63_vm8 = vcmp.eq.s32.totalorder %v54_v26, %v56_v5  ;;  %vm64_vm9 = vcmp.eq.s32.totalorder %v55_v28, %v56_v5 }
  0x15   :  { %v177_v19 = vsel %vm61_vm6, 1.0, %v279_v7  ;;  %140 = vmatpush.msra.mxu0 %v84_v21  ;;  %187 = vmatpush.msra.mxu1 %v84_v21  ;;  %v178_v25 = vsel %vm62_vm7, 1.0, %v279_v7  ;;  %v179_v27 = vsel %vm63_vm8, 1.0, %v279_v7  ;;  %v180_v29 = vsel %vm64_vm9, 1.0, %v279_v7 }
  0x17   :  { %141 = vmatpush.msra.mxu0 %v83_v22  ;;  %188 = vmatpush.msra.mxu1 %v83_v22 }
  0x19   :  { %142 = vmatpush.msra.mxu0 %v82_v23  ;;  %189 = vmatpush.msra.mxu1 %v82_v23 }
  0x1b   :  { %143 = vmatpush.msra.mxu0 %v81_v24  ;;  %190 = vmatpush.msra.mxu1 %v81_v24 }
  0x1c   :  { %90 = vxpose.xlu0.b32.cont [2/8] (short) (narrow) %v174_v9, 16 }
  0x24   :  { %91 = vxpose.xlu0.b32.cont [3/8] (short) (narrow) %v175_v11, 16 }
  0x2c   :  { %92 = vxpose.xlu0.b32.cont [4/8] (short) (narrow) %v176_v13, 16 }
  0x34   :  { %93 = vxpose.xlu0.b32.cont [5/8] (short) (narrow) %v177_v19, 16 }
  0x3c   :  { %94 = vxpose.xlu0.b32.cont [6/8] (short) (narrow) %v178_v25, 16 }
  0x44   :  { %95 = vxpose.xlu0.b32.cont [7/8] (short) (narrow) %v179_v27, 16 }
  0x4c   :  { %96 = vxpose.xlu0.b32.end [8/8] (short) (narrow) %v180_v29, 16 }
  0xb8   :  { %v105_v30 = vpop.trf.xlu0 }
  0xb9   :  { %181 = vmatmul.msk.f32.vlgmr.msra.gmra.mxu0 %vm121_vm10, %v105_v30 }
  0xc0   :  { %v106_v31 = vpop.trf.xlu0 }
  0xc1   :  { %182 = vmatmul.msk.f32.vlgmr.msra.gmra.mxu1 %vm121_vm10, %v106_v31 }
 0x136   :  { %v145_v32 = vpop.f32.mrf.mxu0 }
 0x137   :  { %151 = vst [vmem:[#allocation7] sm:$0xff] %v145_v32 }
 0x13e   :  { %v148_v33 = vpop.f32.mrf.mxu1 }
 0x13f   :  { %152 = vst [vmem:[#allocation7 + $0x8] sm:$0xff] %v148_v33 }
 0x140   :  { %165 = dma.vmem_to_hbm [thread:$0]  %s158_s1, 256, %s160_s23, [#allocation4], %s277_s19, %s277_s19, %s278_s20  }
 0x141   :  { %273 = dma.done.wait [#allocation4], 256  }
 0x142   :  { %274 = vsyncadd [#allocation4], 4294967040 }
 0x143   :  { %170 = vsyncpa [#allocation3], 1 }
 0x144   :  { %171 = vsyncpa [#allocation6], 1 }
 0x145   :  { %172 = vsyncpa [#allocation4], 1 }

</bundles_post_ra>
